<compile_context>
chip_gen: v6e
topology: v6e:2x2x1
jax: 0.10.0
libtpu: 0.0.40
codegen_flags: <defaults>
</compile_context>

<pallas_src>
import functools

import jax
import jax.numpy as jnp
from jax.experimental import pallas as pl
from jax.experimental.pallas import tpu as pltpu


# ---------------------------------------------------------------------------
# Per-chip VMEM budgeting
# ---------------------------------------------------------------------------
def _vmem_budget():
    """Returns (input/output buffer budget, vmem_limit_bytes) for this chip."""
    cap = 64 * 1024 * 1024              # conservative fallback (v7x physical)
    try:
        info = pltpu.get_tpu_info()
        cap = int(getattr(info, "vmem_capacity_bytes", cap))
    except Exception:
        pass
    cap = max(cap, 32 * 1024 * 1024)
    # ~50% of physical VMEM for the (double-buffered) kernel operands, and an
    # explicit scoped-VMEM limit at 75% of physical:
    #   v5e/v6e (128 MiB): 64 MiB budget / 96 MiB limit
    #   v7x     ( 64 MiB): 32 MiB budget / 48 MiB limit
    return int(cap * 0.50), int(cap * 0.75)


_TILE_CANDIDATES = (1024, 512, 256, 128)


# ---------------------------------------------------------------------------
# Direct path:  sum((A @ B^T)^2) with full-K row tiles
# ---------------------------------------------------------------------------
def _fro_sq_kernel(a_ref, b_ref, out_ref, acc_ref, *, tn, tm, n_rows, m_rows,
                   mask_rows, mask_cols):
    """acc += sum((A_tile @ B_tile^T)^2); output written once per row tile."""
    i = pl.program_id(0)
    j = pl.program_id(1)
    nj = pl.num_programs(1)

    @pl.when(j == 0)
    def _():
        acc_ref[...] = jnp.zeros_like(acc_ref)

    p = jax.lax.dot_general(
        a_ref[...], b_ref[...],
        dimension_numbers=(((1,), (1,)), ((), ())),
        preferred_element_type=jnp.float32)             # (tn, tm) f32

    if mask_rows or mask_cols:
        # Only the last row / column tile carries padded rows; gate the
        # iota/compare/select so interior tiles skip it entirely.
        conds = []
        if mask_rows:
            conds.append(i == pl.num_programs(0) - 1)
        if mask_cols:
            conds.append(j == nj - 1)
        edge = conds[0]
        for c in conds[1:]:
            edge = jnp.logical_or(edge, c)

        @pl.when(edge)
        def _():
            pm = p
            if mask_rows:
                rows = i * tn + jax.lax.broadcasted_iota(jnp.int32, p.shape, 0)
                pm = jnp.where(rows < n_rows, pm, 0.0)
            if mask_cols:
                cols = j * tm + jax.lax.broadcasted_iota(jnp.int32, p.shape, 1)
                pm = jnp.where(cols < m_rows, pm, 0.0)
            acc_ref[...] += jnp.sum(pm * pm)

        @pl.when(jnp.logical_not(edge))
        def _():
            acc_ref[...] += jnp.sum(p * p)
    else:
        acc_ref[...] += jnp.sum(p * p)

    # Write the (lane-dense) output block only once, at the last column tile.
    @pl.when(j == nj - 1)
    def _():
        out_ref[...] = acc_ref[...]


def _fro_sq_direct(A, B, budget, vmem_limit, tile_cap=None):
    N, K = A.shape
    M, _ = B.shape

    # ||A B^T||_F == ||B A^T||_F: make A the larger operand so that the matrix
    # re-streamed across the inner grid axis (B) is the smaller one.
    if M > N:
        A, B = B, A
        N, M = M, N

    isa = jnp.dtype(A.dtype).itemsize
    isb = jnp.dtype(B.dtype).itemsize

    def fits(tn, tm):
        # Both operands are double-buffered by the Pallas pipeline.
        return 2 * tn * K * isa + 2 * tm * K * isb <= budget

    cands = (tile_cap,) if tile_cap is not None else _TILE_CANDIDATES

    tn = tm = None
    if tile_cap is None and fits(min(N, 128), M):
        # Keep B fully VMEM-resident: its block index is constant across the
        # whole grid, so it is DMA'd from HBM exactly once.
        tm = M
        for c in cands:
            cand_tn = N if N <= c else c
            if fits(cand_tn, M):
                tn = cand_tn
                break
    if tn is None:
        tm = None
        for ca in cands:                  # prefer large tn: fewer B re-reads
            cand_tn = N if N <= ca else ca
            for cb in cands:
                cand_tm = M if M <= cb else cb
                if fits(cand_tn, cand_tm):
                    tn, tm = cand_tn, cand_tm
                    break
            if tn is not None:
                break
    if tn is None or tm is None:
        # TODO(synk): K-tiled reduction path for huge feature dims.
        raise NotImplementedError("feature dim too large for full-K blocks")

    gi = pl.cdiv(N, tn)
    gj = pl.cdiv(M, tm)

    kernel = functools.partial(
        _fro_sq_kernel, tn=tn, tm=tm, n_rows=N, m_rows=M,
        mask_rows=(N % tn) != 0, mask_cols=(M % tm) != 0)

    out = pl.pallas_call(
        kernel,
        out_shape=jax.ShapeDtypeStruct((gi, 8, 128), jnp.float32),
        grid_spec=pltpu.PrefetchScalarGridSpec(
            num_scalar_prefetch=0,
            grid=(gi, gj),
            in_specs=[
                pl.BlockSpec((tn, K), lambda i, j: (i, 0)),
                pl.BlockSpec((tm, K), lambda i, j: (j, 0)),
            ],
            out_specs=pl.BlockSpec((1, 8, 128), lambda i, j: (i, 0, 0)),
            scratch_shapes=[pltpu.VMEM((1, 8, 128), jnp.float32)],
        ),
        compiler_params=pltpu.CompilerParams(
            dimension_semantics=("parallel", "arbitrary"),
            vmem_limit_bytes=vmem_limit),
    )(A, B)

    return out[:, 0, 0].sum()


# ---------------------------------------------------------------------------
# Gram path:  ||A B^T||_F^2 = <A^T A, B^T B>_F   (good when K < rows)
# ---------------------------------------------------------------------------
def _gram_kernel(x_ref, g_ref, *, tn, n_rows, mask_rows):
    """g += X_tile^T @ X_tile, accumulated over row tiles."""
    i = pl.program_id(0)
    ni = pl.num_programs(0)

    @pl.when(i == 0)
    def _():
        g_ref[...] = jnp.zeros_like(g_ref)

    x = x_ref[...]                                      # (tn, K)

    def accum(xv):
        g_ref[...] += jax.lax.dot_general(
            xv, xv, dimension_numbers=(((0,), (0,)), ((), ())),
            preferred_element_type=jnp.float32)         # (K, K) f32

    if mask_rows:
        @pl.when(i == ni - 1)
        def _():
            rows = i * tn + jax.lax.broadcasted_iota(jnp.int32, x.shape, 0)
            accum(jnp.where(rows < n_rows, x, jnp.zeros_like(x)))

        @pl.when(i != ni - 1)
        def _():
            accum(x)
    else:
        accum(x)


def _gram(X, budget, vmem_limit, tile_cap=None):
    N, K = X.shape
    itemsize = jnp.dtype(X.dtype).itemsize
    out_bytes = 2 * K * K * 4                           # f32 Gram, buffered

    cands = (tile_cap,) if tile_cap is not None else _TILE_CANDIDATES
    tn = None
    for c in cands:
        cand = N if N <= c else c
        if out_bytes + 2 * cand * K * itemsize <= budget:
            tn = cand
            break
    if tn is None:
        raise NotImplementedError("feature dim too large for the Gram path")

    gi = pl.cdiv(N, tn)
    kernel = functools.partial(_gram_kernel, tn=tn, n_rows=N,
                               mask_rows=(N % tn) != 0)
    return pl.pallas_call(
        kernel,
        out_shape=jax.ShapeDtypeStruct((K, K), jnp.float32),
        grid_spec=pltpu.PrefetchScalarGridSpec(
            num_scalar_prefetch=0,
            grid=(gi,),
            in_specs=[pl.BlockSpec((tn, K), lambda i: (i, 0))],
            out_specs=pl.BlockSpec((K, K), lambda i: (0, 0)),
        ),
        compiler_params=pltpu.CompilerParams(
            dimension_semantics=("arbitrary",),
            vmem_limit_bytes=vmem_limit),
    )(X)


# ---------------------------------------------------------------------------
# Dispatch + public wrapper
# ---------------------------------------------------------------------------
def _fro_sq(A, B, *, tile_cap=None):
    """sum((A @ B^T)**2) as float32, via Pallas TPU kernels."""
    if tile_cap is not None:
        assert tile_cap % 8 == 0
    budget, vmem_limit = _vmem_budget()
    N, K = A.shape
    M, Kb = B.shape
    assert K == Kb, "feature dims must match"

    itemsize = max(jnp.dtype(A.dtype).itemsize, jnp.dtype(B.dtype).itemsize)
    gram_fits = (2 * K * K * 4 + 2 * min(128, max(N, M)) * K * itemsize) <= budget
    # Gram formulation wins (with a 2x margin) when (N+M)*K^2 < N*M*K.
    if gram_fits and (N + M) * K <= N * M:
        ga = _gram(A, budget, vmem_limit, tile_cap=tile_cap)
        gb = _gram(B, budget, vmem_limit, tile_cap=tile_cap)
        return jnp.sum(ga * gb)
    return _fro_sq_direct(A, B, budget, vmem_limit, tile_cap=tile_cap)


@jax.jit
def separate(i_sp, i_sh, t_sh, t_sp):
    """Forward pass of the PyTorch `Separate` module."""
    ss_t = _fro_sq(t_sp, t_sh)
    ss_i = _fro_sq(i_sp, i_sh)
    return (jnp.sqrt(ss_t) + jnp.sqrt(ss_i)) * 0.5


def _ref_separate(i_sp, i_sh, t_sh, t_sp):
    return (jnp.linalg.norm(t_sp @ t_sh.T) + jnp.linalg.norm(i_sp @ i_sh.T)) * 0.5


if __name__ == "__main__":
    key = jax.random.PRNGKey(0)

    # --- Test 1: direct path (K > rows), everything VMEM-resident ----------
    k1, k2, k3, k4, key = jax.random.split(key, 5)
    i_sp = jax.random.normal(k1, (16, 256), dtype=jnp.float32)
    i_sh = jax.random.normal(k2, (24, 256), dtype=jnp.float32)
    t_sh = jax.random.normal(k3, (24, 256), dtype=jnp.float32)
    t_sp = jax.random.normal(k4, (16, 256), dtype=jnp.float32)
    loss = separate(i_sp, i_sh, t_sh, t_sp)
    jax.block_until_ready(loss)
    ref = _ref_separate(i_sp, i_sh, t_sh, t_sp)
    assert jnp.allclose(loss, ref, rtol=1e-3, atol=1e-3), (loss, ref)

    # --- Test 2: Gram-matrix path (K < rows) -------------------------------
    k1, k2, k3, k4, key = jax.random.split(key, 5)
    i_sp2 = jax.random.normal(k1, (64, 8), dtype=jnp.float32)
    i_sh2 = jax.random.normal(k2, (72, 8), dtype=jnp.float32)
    t_sh2 = jax.random.normal(k3, (80, 16), dtype=jnp.float32)
    t_sp2 = jax.random.normal(k4, (96, 16), dtype=jnp.float32)
    loss2 = separate(i_sp2, i_sh2, t_sh2, t_sp2)
    jax.block_until_ready(loss2)
    ref2 = _ref_separate(i_sp2, i_sh2, t_sh2, t_sp2)
    assert jnp.allclose(loss2, ref2, rtol=1e-3, atol=1e-3), (loss2, ref2)

    # --- Test 3: forced tiny tiles -> ragged edge masks, streaming, swap ---
    k1, k2, k3, k4, key = jax.random.split(key, 5)
    a3 = jax.random.normal(k1, (20, 32), dtype=jnp.float32)
    b3 = jax.random.normal(k2, (12, 32), dtype=jnp.float32)
    ss3 = _fro_sq(a3, b3, tile_cap=8)            # direct path, ragged i and j
    ss3_swap = _fro_sq(b3, a3, tile_cap=8)       # exercises the operand swap
    jax.block_until_ready((ss3, ss3_swap))
    ref3 = jnp.sum((a3 @ b3.T) ** 2)
    assert jnp.allclose(ss3, ref3, rtol=1e-3, atol=1e-3), (ss3, ref3)
    assert jnp.allclose(ss3_swap, ref3, rtol=1e-3, atol=1e-3), (ss3_swap, ref3)

    # --- Test 4: Gram path with ragged row tiles ----------------------------
    x4 = jax.random.normal(k3, (20, 8), dtype=jnp.float32)
    y4 = jax.random.normal(k4, (24, 8), dtype=jnp.float32)
    ss4 = _fro_sq(x4, y4, tile_cap=8)
    jax.block_until_ready(ss4)
    ref4 = jnp.sum((x4 @ y4.T) ** 2)
    assert jnp.allclose(ss4, ref4, rtol=1e-3, atol=1e-3), (ss4, ref4)

    print("KERNEL_OK")
</pallas_src>

<mosaic_0001>
module attributes {stable_mosaic.version = 11 : i64} {
  func.func @_fro_sq_kernel(%arg0: i32, %arg1: i32, %arg2: memref<24x256xf32, #tpu.memory_space<vmem>>, %arg3: memref<16x256xf32, #tpu.memory_space<vmem>>, %arg4: memref<1x8x128xf32, #tpu.memory_space<vmem>>, %arg5: memref<1x8x128xf32, #tpu.memory_space<vmem>>) attributes {dimension_semantics = [#tpu.dimension_semantics<parallel>, #tpu.dimension_semantics<arbitrary>], iteration_bounds = array<i64: 1, 1>, scalar_prefetch = 0 : i64, scratch_operands = 1 : i64, tpu.core_type = #tpu.core_type<tc>, window_params = [{transform_indices = @transform_0, window_bounds = array<i64: 24, 256>}, {transform_indices = @transform_1, window_bounds = array<i64: 16, 256>}, {transform_indices = @transform_2, window_bounds = array<i64: 1, 8, 128>}]} {
    %c0_i32 = arith.constant 0 : i32
    %0 = arith.cmpi eq, %arg1, %c0_i32 : i32
    %1 = arith.extui %0 : i1 to i32
    %c0_i32_0 = arith.constant 0 : i32
    %2 = arith.cmpi ne, %1, %c0_i32_0 : i32
    scf.if %2 {
      %cst_13 = arith.constant 0.000000e+00 : f32
      %18 = vector.broadcast %cst_13 : f32 to vector<1x8x128xf32>
      %c0_14 = arith.constant 0 : index
      %c0_15 = arith.constant 0 : index
      %c0_16 = arith.constant 0 : index
      %19 = vector.load %arg5[%c0_14, %c0_15, %c0_16] : memref<1x8x128xf32, #tpu.memory_space<vmem>>, vector<1x8x128xf32>
      tpu.vector_store %arg5[%c0_14, %c0_15, %c0_16], %18 {strides = array<i32>} : memref<1x8x128xf32, #tpu.memory_space<vmem>>, vector<1x8x128xf32>,
    } else {
    }
    %c0 = arith.constant 0 : index
    %c0_1 = arith.constant 0 : index
    %3 = vector.load %arg2[%c0, %c0_1] : memref<24x256xf32, #tpu.memory_space<vmem>>, vector<24x256xf32>
    %c0_2 = arith.constant 0 : index
    %c0_3 = arith.constant 0 : index
    %4 = vector.load %arg3[%c0_2, %c0_3] : memref<16x256xf32, #tpu.memory_space<vmem>>, vector<16x256xf32>
    %cst = arith.constant dense<0.000000e+00> : vector<24x16xf32>
    %5 = tpu.matmul %3, %4, %cst {dimension_numbers = #tpu.dot_dimension_numbers<[1], [1], [0], [0], [0, 0, 1, 0], [], []>} : vector<24x256xf32>, vector<16x256xf32>, vector<24x16xf32> -> vector<24x16xf32>
    %c0_4 = arith.constant 0 : index
    %c0_5 = arith.constant 0 : index
    %c0_6 = arith.constant 0 : index
    %6 = vector.load %arg5[%c0_4, %c0_5, %c0_6] : memref<1x8x128xf32, #tpu.memory_space<vmem>>, vector<1x8x128xf32>
    %7 = arith.mulf %5, %5 : vector<24x16xf32>
    %8 = vector.shape_cast %7 : vector<24x16xf32> to vector<1x24x16xf32>
    %cst_7 = arith.constant dense<0.000000e+00> : vector<1xf32>
    %9 = vector.multi_reduction <add>, %8, %cst_7 [1, 2] : vector<1x24x16xf32> to vector<1xf32>
    %10 = vector.shape_cast %9 : vector<1xf32> to vector<1x1x1xf32>
    %11 = vector.extract %10[0, 0, 0] : f32 from vector<1x1x1xf32>
    %12 = vector.broadcast %11 : f32 to vector<1x8x128xf32>
    %13 = arith.addf %6, %12 : vector<1x8x128xf32>
    %c0_8 = arith.constant 0 : index
    %c0_9 = arith.constant 0 : index
    %c0_10 = arith.constant 0 : index
    %14 = vector.load %arg5[%c0_8, %c0_9, %c0_10] : memref<1x8x128xf32, #tpu.memory_space<vmem>>, vector<1x8x128xf32>
    tpu.vector_store %arg5[%c0_8, %c0_9, %c0_10], %13 {strides = array<i32>} : memref<1x8x128xf32, #tpu.memory_space<vmem>>, vector<1x8x128xf32>,
    %c0_i32_11 = arith.constant 0 : i32
    %15 = arith.cmpi eq, %arg1, %c0_i32_11 : i32
    %16 = arith.extui %15 : i1 to i32
    %c0_i32_12 = arith.constant 0 : i32
    %17 = arith.cmpi ne, %16, %c0_i32_12 : i32
    scf.if %17 {
      %c0_13 = arith.constant 0 : index
      %c0_14 = arith.constant 0 : index
      %c0_15 = arith.constant 0 : index
      %18 = vector.load %arg5[%c0_13, %c0_14, %c0_15] : memref<1x8x128xf32, #tpu.memory_space<vmem>>, vector<1x8x128xf32>
      %c0_16 = arith.constant 0 : index
      %c0_17 = arith.constant 0 : index
      %c0_18 = arith.constant 0 : index
      %19 = vector.load %arg4[%c0_16, %c0_17, %c0_18] : memref<1x8x128xf32, #tpu.memory_space<vmem>>, vector<1x8x128xf32>
      tpu.vector_store %arg4[%c0_16, %c0_17, %c0_18], %18 {strides = array<i32>} : memref<1x8x128xf32, #tpu.memory_space<vmem>>, vector<1x8x128xf32>,
    } else {
    }
    return
  }
  func.func @transform_0(%arg0: i32, %arg1: i32) -> (i32, i32) {
    %c0_i32 = arith.constant 0 : i32
    %c0_i32_0 = arith.constant 0 : i32
    return %arg0, %c0_i32 : i32, i32
  }
  func.func @transform_1(%arg0: i32, %arg1: i32) -> (i32, i32) {
    %c0_i32 = arith.constant 0 : i32
    %c0_i32_0 = arith.constant 0 : i32
    return %arg1, %c0_i32 : i32, i32
  }
  func.func @transform_2(%arg0: i32, %arg1: i32) -> (i32, i32, i32) {
    %c0_i32 = arith.constant 0 : i32
    %c0_i32_0 = arith.constant 0 : i32
    %c0_i32_1 = arith.constant 0 : i32
    return %arg0, %c0_i32, %c0_i32_0 : i32, i32, i32
  }
}

module attributes {stable_mosaic.version = 11 : i64} {
  func.func @_fro_sq_kernel(%arg0: i32, %arg1: i32, %arg2: memref<24x256xf32, #tpu.memory_space<vmem>>, %arg3: memref<16x256xf32, #tpu.memory_space<vmem>>, %arg4: memref<1x8x128xf32, #tpu.memory_space<vmem>>, %arg5: memref<1x8x128xf32, #tpu.memory_space<vmem>>) attributes {dimension_semantics = [#tpu.dimension_semantics<parallel>, #tpu.dimension_semantics<arbitrary>], iteration_bounds = array<i64: 1, 1>, scalar_prefetch = 0 : i64, scratch_operands = 1 : i64, tpu.core_type = #tpu.core_type<tc>, window_params = [{transform_indices = @transform_0, window_bounds = array<i64: 24, 256>}, {transform_indices = @transform_1, window_bounds = array<i64: 16, 256>}, {transform_indices = @transform_2, window_bounds = array<i64: 1, 8, 128>}]} {
    %c0_i32 = arith.constant 0 : i32
    %0 = arith.cmpi eq, %arg1, %c0_i32 : i32
    %1 = arith.extui %0 : i1 to i32
    %c0_i32_0 = arith.constant 0 : i32
    %2 = arith.cmpi ne, %1, %c0_i32_0 : i32
    scf.if %2 {
      %cst_13 = arith.constant 0.000000e+00 : f32
      %18 = vector.broadcast %cst_13 : f32 to vector<1x8x128xf32>
      %c0_14 = arith.constant 0 : index
      %c0_15 = arith.constant 0 : index
      %c0_16 = arith.constant 0 : index
      %19 = vector.load %arg5[%c0_14, %c0_15, %c0_16] : memref<1x8x128xf32, #tpu.memory_space<vmem>>, vector<1x8x128xf32>
      tpu.vector_store %arg5[%c0_14, %c0_15, %c0_16], %18 {strides = array<i32>} : memref<1x8x128xf32, #tpu.memory_space<vmem>>, vector<1x8x128xf32>,
    } else {
    }
    %c0 = arith.constant 0 : index
    %c0_1 = arith.constant 0 : index
    %3 = vector.load %arg2[%c0, %c0_1] : memref<24x256xf32, #tpu.memory_space<vmem>>, vector<24x256xf32>
    %c0_2 = arith.constant 0 : index
    %c0_3 = arith.constant 0 : index
    %4 = vector.load %arg3[%c0_2, %c0_3] : memref<16x256xf32, #tpu.memory_space<vmem>>, vector<16x256xf32>
    %cst = arith.constant dense<0.000000e+00> : vector<24x16xf32>
    %5 = tpu.matmul %3, %4, %cst {dimension_numbers = #tpu.dot_dimension_numbers<[1], [1], [0], [0], [0, 0, 1, 0], [], []>} : vector<24x256xf32>, vector<16x256xf32>, vector<24x16xf32> -> vector<24x16xf32>
    %c0_4 = arith.constant 0 : index
    %c0_5 = arith.constant 0 : index
    %c0_6 = arith.constant 0 : index
    %6 = vector.load %arg5[%c0_4, %c0_5, %c0_6] : memref<1x8x128xf32, #tpu.memory_space<vmem>>, vector<1x8x128xf32>
    %7 = arith.mulf %5, %5 : vector<24x16xf32>
    %8 = vector.shape_cast %7 : vector<24x16xf32> to vector<1x24x16xf32>
    %cst_7 = arith.constant dense<0.000000e+00> : vector<1xf32>
    %9 = vector.multi_reduction <add>, %8, %cst_7 [1, 2] : vector<1x24x16xf32> to vector<1xf32>
    %10 = vector.shape_cast %9 : vector<1xf32> to vector<1x1x1xf32>
    %11 = vector.extract %10[0, 0, 0] : f32 from vector<1x1x1xf32>
    %12 = vector.broadcast %11 : f32 to vector<1x8x128xf32>
    %13 = arith.addf %6, %12 : vector<1x8x128xf32>
    %c0_8 = arith.constant 0 : index
    %c0_9 = arith.constant 0 : index
    %c0_10 = arith.constant 0 : index
    %14 = vector.load %arg5[%c0_8, %c0_9, %c0_10] : memref<1x8x128xf32, #tpu.memory_space<vmem>>, vector<1x8x128xf32>
    tpu.vector_store %arg5[%c0_8, %c0_9, %c0_10], %13 {strides = array<i32>} : memref<1x8x128xf32, #tpu.memory_space<vmem>>, vector<1x8x128xf32>,
    %c0_i32_11 = arith.constant 0 : i32
    %15 = arith.cmpi eq, %arg1, %c0_i32_11 : i32
    %16 = arith.extui %15 : i1 to i32
    %c0_i32_12 = arith.constant 0 : i32
    %17 = arith.cmpi ne, %16, %c0_i32_12 : i32
    scf.if %17 {
      %c0_13 = arith.constant 0 : index
      %c0_14 = arith.constant 0 : index
      %c0_15 = arith.constant 0 : index
      %18 = vector.load %arg5[%c0_13, %c0_14, %c0_15] : memref<1x8x128xf32, #tpu.memory_space<vmem>>, vector<1x8x128xf32>
      %c0_16 = arith.constant 0 : index
      %c0_17 = arith.constant 0 : index
      %c0_18 = arith.constant 0 : index
      %19 = vector.load %arg4[%c0_16, %c0_17, %c0_18] : memref<1x8x128xf32, #tpu.memory_space<vmem>>, vector<1x8x128xf32>
      tpu.vector_store %arg4[%c0_16, %c0_17, %c0_18], %18 {strides = array<i32>} : memref<1x8x128xf32, #tpu.memory_space<vmem>>, vector<1x8x128xf32>,
    } else {
    }
    return
  }
  func.func @transform_0(%arg0: i32, %arg1: i32) -> (i32, i32) {
    %c0_i32 = arith.constant 0 : i32
    %c0_i32_0 = arith.constant 0 : i32
    return %arg0, %c0_i32 : i32, i32
  }
  func.func @transform_1(%arg0: i32, %arg1: i32) -> (i32, i32) {
    %c0_i32 = arith.constant 0 : i32
    %c0_i32_0 = arith.constant 0 : i32
    return %arg1, %c0_i32 : i32, i32
  }
  func.func @transform_2(%arg0: i32, %arg1: i32) -> (i32, i32, i32) {
    %c0_i32 = arith.constant 0 : i32
    %c0_i32_0 = arith.constant 0 : i32
    %c0_i32_1 = arith.constant 0 : i32
    return %arg0, %c0_i32, %c0_i32_0 : i32, i32, i32
  }
}

</mosaic_0001>

<bundles_post_ra>
// kernel: separate.3
= control target key start
LH: loop header
LB: loop body
LE: loop exit
PB: predicated region body
PF: predicated region fallthrough
CT: control target
= control target key end

     0   :  { %7 = vsyncpa [#allocation4], 0  ;;  %s249_s0 = inlined_call_operand.hbm [shape: f32[24,256], index: 0, kind: input, shape index: {}]   ;;  %s250_s1 = inlined_call_operand.hbm [shape: f32[16,256], index: 1, kind: input, shape index: {}]   ;;  %s251_s2 = inlined_call_operand.vmem [shape: f32[1,8,128], index: 2, kind: output, shape index: {}]  }
   0x1   :  { %8 = vsyncpa [#allocation6], 0  ;;  %s221_s9 = smov [#allocation3]  }
   0x2   :  { %s14_s10 = sshll.u32 %s221_s9, 4  ;;  %s15_s10 = int_to_ptr.vmem [resolvable:$true] %s14_s10 }
   0x3   :  { %s185_s11 = scalar_lea.vmem %s15_s10, 768  ;;  %p190_p1 = scmp.lt.s32.totalorder %s15_s10, %s15_s10 }
   0x4   :  { %p186_p0 = scmp.ne.s32.totalorder %s15_s10, %s185_s11  ;;  %p191_p2 = scmp.lt.s32.totalorder %s185_s11, %s185_s11 }
   0x6   :  { %p192_p3 = por %p191_p2, %p190_p1 }
   0x8   :  { %p193_p4 = pnand %p192_p3, %p186_p0 }
   0xa   :  { %196 = shalt.err (!%p193_p4)
}
   0xb   :  { %s222_s12 = smov 256   ;;  %s223_s13 = smov 16  }
   0xc   :  { %20 = dma.hbm_to_vmem [thread:$0]  %s249_s0, 768, %s15_s10, [#allocation4], %s222_s12, %s222_s12, %s223_s13  }
   0xd   :  { %s224_s16 = smov [#allocation5]  }
   0xe   :  { %s26_s17 = sshll.u32 %s224_s16, 4  ;;  %s27_s17 = int_to_ptr.vmem [resolvable:$true] %s26_s17 }
   0xf   :  { %s205_s18 = scalar_lea.vmem %s27_s17, 512  ;;  %p210_p6 = scmp.lt.s32.totalorder %s27_s17, %s27_s17 }
  0x10   :  { %p206_p5 = scmp.ne.s32.totalorder %s27_s17, %s205_s18  ;;  %p211_p7 = scmp.lt.s32.totalorder %s205_s18, %s205_s18 }
  0x12   :  { %p212_p8 = por %p211_p7, %p210_p6 }
  0x14   :  { %p213_p9 = pnand %p212_p8, %p206_p5 }
  0x16   :  { %216 = shalt.err (!%p213_p9)
}
  0x17   :  { %32 = dma.hbm_to_vmem [thread:$0]  %s250_s1, 512, %s27_s17, [#allocation6], %s222_s12, %s222_s12, %s223_s13  }
  0x18   :  { %217 = dma.done.wait [#allocation4], 768  }
  0x19   :  { %218 = vsyncadd [#allocation4], 4294966528 }
  0x1a   :  { %219 = dma.done.wait [#allocation6], 512  }
  0x1b   :  { %220 = vsyncadd [#allocation6], 4294966784  ;;  %v53_v0 = vld [vmem:[#allocation5 + $0x18] sm:$0xff]  ;;  %v52_v1 = vld [vmem:[#allocation5 + $0x10] sm:$0xff]  ;;  %vm138_vm0 = vcmask 130048  }
  0x1c   :  { %v51_v2 = vld [vmem:[#allocation5 + $0x8] sm:$0xff]  ;;  %82 = vmatprep.subr.mxu0 %v53_v0  ;;  %167 = vmatprep.subr.mxu1 %v53_v0  ;;  %v45_v3 = vld [vmem:[#allocation3 + $0x8] sm:$0xff]  ;;  %v50_v5 = vld [vmem:[#allocation5] sm:$0xff] }
  0x1d   :  { %v47_v4 = vld [vmem:[#allocation3 + $0x18] sm:$0xff]  ;;  %83 = vmatpush1.xpose.msra.mxu0 %v52_v1  ;;  %169 = vmatpush1.xpose.msra.mxu1 %v52_v1  ;;  %v44_v6 = vld [vmem:[#allocation3] sm:$0xff]  ;;  %v46_v7 = vld [vmem:[#allocation3 + $0x10] sm:$0xff] }
  0x1e   :  { %84 = vmatprep.subr.mxu0 %v51_v2  ;;  %168 = vmatprep.subr.mxu1 %v51_v2  ;;  %v49_v8 = vld [vmem:[#allocation3 + $0x28] sm:$0xff]  ;;  %v48_v9 = vld [vmem:[#allocation3 + $0x20] sm:$0xff] }
  0x1f   :  { %118 = vmatprep.mubr.f32.mxu0 %v45_v3  ;;  %123 = vmatprep.mubr.f32.mxu1 %v47_v4 }
  0x21   :  { %85 = vmatpush1.xpose.msra.mxu0 %v50_v5  ;;  %170 = vmatpush1.xpose.msra.mxu1 %v50_v5 }
  0x24   :  { %119 = vmatmul.mubr.f32.vlgmr.msra.gmra.mxu0 %v44_v6  ;;  %124 = vmatmul.mubr.f32.vlgmr.msra.gmra.mxu1 %v46_v7 }
  0x25   :  { %128 = vmatprep.mubr.f32.mxu1 %v49_v8 }
  0x28   :  { %129 = vmatmul.mubr.f32.gmra.mxu1 %v48_v9 }
  0xe4   :  { %v120_v10 = vpop.f32.mrf.mxu0  ;;  %v125_v11 = vpop.f32.mrf.mxu1 }
  0xe5   :  { %v135_v12 = vmul.f32 %v120_v10, %v120_v10  ;;  %v136_v13 = vmul.f32 %v125_v11, %v125_v11 }
  0xe6   :  { %v122_v14 = vpop.f32.mrf.mxu0  ;;  %v127_v15 = vpop.f32.mrf.mxu1 }
  0xe7   :  { %v139_v16 = vsel %vm138_vm0, %v135_v12, 0.0  ;;  %v140_v17 = vsel %vm138_vm0, %v136_v13, 0.0 }
  0xe8   :  { %v130_v18 = vpop.f32.mrf.mxu1  ;;  %v141_v21 = vadd.f32 %v140_v17, %v139_v16 }
  0xe9   :  { %v137_v19 = vmul.f32 %v130_v18, %v130_v18 }
  0xea   :  { %v132_v20 = vpop.f32.mrf.mxu1 }
  0xeb   :  { %v142_v22 = vsel %vm138_vm0, %v137_v19, 0.0 }
  0xec   :  { %v143_v23 = vadd.f32 %v142_v22, %v141_v21 }
  0xee   :  { %144 = vadd.xlane.f32.xlu0 %v143_v23 }
 0x177   :  { %v145_v24 = vpop.xlane.xlu0 %144 }
 0x178   :  { %v146_v25 = vrot.slane %v145_v24, 4 }
 0x17a   :  { %v147_v26 = vadd.f32 %v146_v25, %v145_v24 }
 0x17c   :  { %v148_v27 = vrot.slane %v147_v26, 2 }
 0x17e   :  { %v149_v28 = vadd.f32 %v148_v27, %v147_v26 }
 0x180   :  { %v150_v29 = vrot.slane %v149_v28, 1 }
 0x182   :  { %v151_v30 = vadd.f32 %v150_v29, %v149_v28 }
 0x184   :  { %171 = vpush %v151_v30 }
 0x1b5   :  { %s172_s0 = spop %171 }
 0x1b6   :  { %v153_v31 = vstv %s172_s0 }
 0x1b7   :  { %160 = vst [vmem:[%s251_s2] sm:$0xff] %v153_v31 }
 0x1b8   :  { %165 = vsyncpa [#allocation4], 1 }
 0x1b9   :  { %166 = vsyncpa [#allocation6], 1 }

// kernel: separate.2
= control target key start
LH: loop header
LB: loop body
LE: loop exit
PB: predicated region body
PF: predicated region fallthrough
CT: control target
= control target key end

     0   :  { %vm110_vm0 = vcmask 130048   ;;  %s191_s1 = inlined_call_operand.vmem [shape: f32[16,256], index: 1, kind: input, shape index: {}]   ;;  %s192_s0 = inlined_call_operand.vmem [shape: f32[24,256], index: 0, kind: input, shape index: {}]   ;;  %s193_s2 = inlined_call_operand.vmem [shape: f32[1,8,128], index: 2, kind: output, shape index: {}]  }
   0x1   :  { %v25_v0 = vld [vmem:[%s191_s1 + $0x18] sm:$0xff]  ;;  %v24_v1 = vld [vmem:[%s191_s1 + $0x10] sm:$0xff]  ;;  %v23_v2 = vld [vmem:[%s191_s1 + $0x8] sm:$0xff] }
   0x2   :  { %54 = vmatprep.subr.mxu0 %v25_v0  ;;  %137 = vmatprep.subr.mxu1 %v25_v0  ;;  %v17_v3 = vld [vmem:[%s192_s0 + $0x8] sm:$0xff]  ;;  %v19_v4 = vld [vmem:[%s192_s0 + $0x18] sm:$0xff]  ;;  %v22_v5 = vld [vmem:[%s191_s1] sm:$0xff] }
   0x3   :  { %55 = vmatpush1.xpose.msra.mxu0 %v24_v1  ;;  %139 = vmatpush1.xpose.msra.mxu1 %v24_v1  ;;  %v16_v6 = vld [vmem:[%s192_s0] sm:$0xff]  ;;  %v18_v7 = vld [vmem:[%s192_s0 + $0x10] sm:$0xff]  ;;  %v21_v8 = vld [vmem:[%s192_s0 + $0x28] sm:$0xff] }
   0x4   :  { %56 = vmatprep.subr.mxu0 %v23_v2  ;;  %138 = vmatprep.subr.mxu1 %v23_v2  ;;  %v20_v9 = vld [vmem:[%s192_s0 + $0x20] sm:$0xff] }
   0x5   :  { %90 = vmatprep.mubr.f32.mxu0 %v17_v3  ;;  %95 = vmatprep.mubr.f32.mxu1 %v19_v4 }
   0x7   :  { %57 = vmatpush1.xpose.msra.mxu0 %v22_v5  ;;  %140 = vmatpush1.xpose.msra.mxu1 %v22_v5 }
   0xa   :  { %91 = vmatmul.mubr.f32.vlgmr.msra.gmra.mxu0 %v16_v6  ;;  %96 = vmatmul.mubr.f32.vlgmr.msra.gmra.mxu1 %v18_v7 }
   0xb   :  { %100 = vmatprep.mubr.f32.mxu1 %v21_v8 }
   0xe   :  { %101 = vmatmul.mubr.f32.gmra.mxu1 %v20_v9 }
  0xca   :  { %v92_v10 = vpop.f32.mrf.mxu0  ;;  %v97_v11 = vpop.f32.mrf.mxu1 }
  0xcb   :  { %v107_v12 = vmul.f32 %v92_v10, %v92_v10  ;;  %v108_v13 = vmul.f32 %v97_v11, %v97_v11 }
  0xcc   :  { %v94_v14 = vpop.f32.mrf.mxu0  ;;  %v99_v15 = vpop.f32.mrf.mxu1 }
  0xcd   :  { %v111_v16 = vsel %vm110_vm0, %v107_v12, 0.0  ;;  %v112_v17 = vsel %vm110_vm0, %v108_v13, 0.0 }
  0xce   :  { %v102_v18 = vpop.f32.mrf.mxu1  ;;  %v113_v21 = vadd.f32 %v112_v17, %v111_v16 }
  0xcf   :  { %v109_v19 = vmul.f32 %v102_v18, %v102_v18 }
  0xd0   :  { %v104_v20 = vpop.f32.mrf.mxu1 }
  0xd1   :  { %v114_v22 = vsel %vm110_vm0, %v109_v19, 0.0 }
  0xd2   :  { %v115_v23 = vadd.f32 %v114_v22, %v113_v21 }
  0xd4   :  { %116 = vadd.xlane.f32.xlu0 %v115_v23 }
 0x15d   :  { %v117_v24 = vpop.xlane.xlu0 %116 }
 0x15e   :  { %v118_v25 = vrot.slane %v117_v24, 4 }
 0x160   :  { %v119_v26 = vadd.f32 %v118_v25, %v117_v24 }
 0x162   :  { %v120_v27 = vrot.slane %v119_v26, 2 }
 0x164   :  { %v121_v28 = vadd.f32 %v120_v27, %v119_v26 }
 0x166   :  { %v122_v29 = vrot.slane %v121_v28, 1 }
 0x168   :  { %v123_v30 = vadd.f32 %v122_v29, %v121_v28 }
 0x16a   :  { %141 = vpush %v123_v30 }
 0x19b   :  { %s142_s0 = spop %141 }
 0x19c   :  { %v125_v31 = vstv %s142_s0 }
 0x19d   :  { %132 = vst [vmem:[%s193_s2] sm:$0xff] %v125_v31 }

</bundles_post_ra>
